<compile_context>
chip_gen: v6e
topology: v6e:2x2x1
jax: 0.10.0
libtpu: 0.0.40
codegen_flags: <defaults>
</compile_context>

<pallas_src>
import functools

import jax
import jax.numpy as jnp
from jax.experimental import pallas as pl
from jax.experimental.pallas import tpu as pltpu


def _attn_kernel(x_ref, wqkv_ref, bqkv_ref, wo_ref, bo_ref, o_ref, *scratch,
                 n_heads, head_dim, q_tile):
    inner = n_heads * head_dim
    n_kv = x_ref.shape[1]          # full sequence length (keys/values)
    cdt = x_ref.dtype              # MXU operand dtype (bf16 in production)
    single_tile = (q_tile == n_kv)
    inv_scale = 1.0 / (head_dim ** 0.5)

    if single_tile:
        # Common ViT case (e.g. N=197): one wide fused QKV MXU pass, f32 acc.
        x = x_ref[0]                                                  # (N, D)
        qkv = (jnp.dot(x, wqkv_ref[...], preferred_element_type=jnp.float32)
               + bqkv_ref[...].astype(jnp.float32))                   # (N, 3I) f32
        q_rows = qkv[:, :inner]                                       # (tq==N, I)
        k = qkv[:, inner:2 * inner].astype(cdt)                       # (N, I)
        v = qkv[:, 2 * inner:].astype(cdt)                            # (N, I)
    else:
        # Query tiling active: project QKV ONCE per batch element into VMEM
        # scratch (qi is the innermost, "arbitrary" grid axis). No recompute
        # of the dominant 2*N*D*3D-FLOP matmul per query tile.
        qkv_sc, = scratch                                             # (N, 3I) cdt

        @pl.when(pl.program_id(1) == 0)
        def _():
            x = x_ref[0]
            qkv = (jnp.dot(x, wqkv_ref[...],
                           preferred_element_type=jnp.float32)
                   + bqkv_ref[...].astype(jnp.float32))
            qkv_sc[...] = qkv.astype(qkv_sc.dtype)

        row0 = pl.multiple_of(pl.program_id(1) * q_tile, q_tile)
        q_rows = qkv_sc[pl.ds(row0, q_tile), :inner]                  # (tq, I)
        k = qkv_sc[:, inner:2 * inner]                                # (N, I)
        v = qkv_sc[:, 2 * inner:]                                     # (N, I)

    # 1/sqrt(head_dim) folded into q: O(tq*I) multiply, not O(tq*N) per head.
    q = (q_rows * inv_scale).astype(cdt)                              # (tq, I)

    # Heads become a batch dimension for the attention einsums.
    q3 = q.reshape(q_tile, n_heads, head_dim).transpose(1, 0, 2)      # (H, tq, Hd)
    k3 = k.reshape(n_kv, n_heads, head_dim).transpose(1, 0, 2)        # (H, N, Hd)
    v3 = v.reshape(n_kv, n_heads, head_dim).transpose(1, 0, 2)        # (H, N, Hd)

    s = jnp.einsum('hqd,hkd->hqk', q3, k3,
                   preferred_element_type=jnp.float32)                # (H, tq, N) f32

    # Numerically-stable softmax with an EXACT divide (probabilities sum to 1).
    s = s - jnp.max(s, axis=-1, keepdims=True)
    p = jnp.exp(s)
    p = p / jnp.sum(p, axis=-1, keepdims=True)

    o = jnp.einsum('hqk,hkd->hqd', p.astype(cdt), v3,
                   preferred_element_type=jnp.float32)                # (H, tq, Hd)

    # Merge heads, then a single deep-contraction output projection.
    o = o.transpose(1, 0, 2).reshape(q_tile, inner)                   # (tq, I)
    out = (jnp.dot(o.astype(wo_ref.dtype), wo_ref[...],
                   preferred_element_type=jnp.float32)
           + bo_ref[...].astype(jnp.float32))                         # (tq, D) f32
    # TODO(synk): nn.Dropout(attn_drop=0.0) is the identity, so it is omitted.
    o_ref[0] = out.astype(o_ref.dtype)


@functools.lru_cache(maxsize=None)
def _single_buffer_supported():
    """Probe once: does this build honor pipeline_mode=pl.Buffered(1) in pallas_call?

    Weight blocks have a constant index_map, so double-buffering them only
    wastes VMEM (ViT-L f32 wqkv alone is ~12.6 MiB; critical on v7x's 64 MiB).
    Fall back silently if unsupported.
    """
    if not hasattr(pl, "Buffered"):
        return False

    def _copy(x_ref, o_ref):
        o_ref[...] = x_ref[...]

    try:
        x = jnp.arange(8 * 128, dtype=jnp.float32).reshape(8, 128)
        y = pl.pallas_call(
            _copy,
            out_shape=jax.ShapeDtypeStruct((8, 128), jnp.float32),
            grid=(1,),
            in_specs=[pl.BlockSpec((8, 128), lambda i: (0, 0),
                                   pipeline_mode=pl.Buffered(1))],
            out_specs=pl.BlockSpec((8, 128), lambda i: (0, 0)),
        )(x)
        return bool(jnp.array_equal(jax.block_until_ready(y), x))
    except Exception:
        return False


def _default_vmem_limit(n, d, inner, n_heads, q_tile, itemsize, single_buf):
    """Size the scoped VMEM budget from the working set, clamped to the chip."""
    head_dim = inner // n_heads
    weights = (d * 3 * inner + 3 * inner + inner * d + d) * itemsize
    weights *= 1 if single_buf else 2
    io = 2 * (n * d + q_tile * d) * itemsize                 # double-buffered x/out
    qkv_scratch = n * 3 * inner * itemsize if q_tile != n else 0
    f32_tmp = 4 * (n * 3 * inner                             # fused QKV projection
                   + 2 * n_heads * q_tile * n                # scores + probs
                   + n_heads * q_tile * head_dim             # attention output
                   + q_tile * d)                             # final projection
    need = int(1.4 * (weights + io + qkv_scratch + f32_tmp))
    try:
        cap = int(getattr(pltpu.get_tpu_info(), "vmem_capacity_bytes"))
    except Exception:
        cap = 64 * 1024 * 1024                               # v7x physical (worst case)
    return max(32 * 1024 * 1024, min(need, int(0.85 * cap)))


def fuse_params(params):
    """One-time fusion of the Q/K/V projections. Call at init, NOT per forward:
    concatenating three (D, I) weights per call re-streams MiBs of HBM."""
    if "wqkv" in params:
        return params
    return {
        "wqkv": jnp.concatenate([params["wq"], params["wk"], params["wv"]], axis=1),
        "bqkv": jnp.concatenate([params["bq"], params["bk"], params["bv"]], axis=1),
        "wo": params["wo"],
        "bo": params["bo"],
    }


def vit_attention_pallas(x, params, n_heads, *, q_tile=None, vmem_limit_bytes=None):
    """x: (B, N, D). params: fused dict from fuse_params() (f32 or bf16)."""
    B, N, D = x.shape
    head_dim = D // n_heads
    inner = n_heads * head_dim

    wqkv, bqkv = params["wqkv"], params["bqkv"]
    wo, bo = params["wo"], params["bo"]

    # Query tiling (second grid axis). Default: 128-row tiles when N allows it.
    if q_tile is None:
        q_tile = 128 if (N % 128 == 0 and N > 128) else N
    assert N % q_tile == 0, "q_tile must divide N"
    assert q_tile == N or q_tile % 8 == 0, "q_tile must be a multiple of 8 (sublane)"
    nq = N // q_tile
    # TODO(synk): for B==1, nq==1 on v7x (2 TensorCores) add a head-axis grid
    # split (or pad N to a multiple of 128) so the second core gets work.

    single_buf = _single_buffer_supported()

    if vmem_limit_bytes is None:
        vmem_limit_bytes = _default_vmem_limit(
            N, D, inner, n_heads, q_tile, jnp.dtype(x.dtype).itemsize, single_buf)

    kernel = functools.partial(_attn_kernel, n_heads=n_heads,
                               head_dim=head_dim, q_tile=q_tile)

    def _resident(shape):
        # Constant index_map => block is resident across the whole grid; a
        # second (double) buffer is dead weight, so single-buffer if possible.
        if single_buf:
            return pl.BlockSpec(shape, lambda b, qi: (0, 0),
                                pipeline_mode=pl.Buffered(1))
        return pl.BlockSpec(shape, lambda b, qi: (0, 0))

    scratch_shapes = [pltpu.VMEM((N, 3 * inner), x.dtype)] if nq > 1 else []
    dims = ("parallel", "arbitrary") if nq > 1 else ("parallel", "parallel")

    return pl.pallas_call(
        kernel,
        out_shape=jax.ShapeDtypeStruct((B, N, D), x.dtype),
        grid_spec=pltpu.PrefetchScalarGridSpec(
            num_scalar_prefetch=0,
            grid=(B, nq),
            in_specs=[
                pl.BlockSpec((1, N, D), lambda b, qi: (b, 0, 0)),  # x (all rows of b)
                _resident((D, 3 * inner)),                         # fused QKV weight
                _resident((1, 3 * inner)),                         # fused QKV bias
                _resident((inner, D)),                             # output proj weight
                _resident((1, D)),                                 # output proj bias
            ],
            out_specs=pl.BlockSpec((1, q_tile, D), lambda b, qi: (b, qi, 0)),
            scratch_shapes=scratch_shapes,
        ),
        compiler_params=pltpu.CompilerParams(
            dimension_semantics=dims,
            vmem_limit_bytes=vmem_limit_bytes),
    )(x, wqkv, bqkv, wo, bo)


def vit_attention_ref(x, params, n_heads):
    """Pure-JAX reference matching the PyTorch forward (unfused params)."""
    B, N, D = x.shape
    head_dim = D // n_heads
    scale = head_dim ** 0.5

    q = x @ params["wq"] + params["bq"]
    k = x @ params["wk"] + params["bk"]
    v = x @ params["wv"] + params["bv"]

    def split(t):  # (B, N, H*Hd) -> (B*H, N, Hd)
        t = t.reshape(B, N, n_heads, head_dim)
        return jnp.transpose(t, (0, 2, 1, 3)).reshape(B * n_heads, N, head_dim)

    q, k, v = split(q), split(k), split(v)
    s = jnp.einsum("bid,bjd->bij", q, k) / scale
    p = jax.nn.softmax(s, axis=-1)
    o = jnp.einsum("bij,bjd->bid", p, v)
    o = o.reshape(B, n_heads, N, head_dim)
    o = jnp.transpose(o, (0, 2, 1, 3)).reshape(B, N, n_heads * head_dim)
    return o @ params["wo"] + params["bo"]


def init_params(key, patch_emb_dim, n_heads, dtype=jnp.float32):
    head_dim = patch_emb_dim // n_heads
    inner = n_heads * head_dim
    ks = jax.random.split(key, 8)
    sc_in = 1.0 / (patch_emb_dim ** 0.5)
    sc_inner = 1.0 / (inner ** 0.5)
    return {
        "wq": (jax.random.normal(ks[0], (patch_emb_dim, inner), jnp.float32) * sc_in).astype(dtype),
        "bq": (jax.random.normal(ks[1], (1, inner), jnp.float32) * 0.02).astype(dtype),
        "wk": (jax.random.normal(ks[2], (patch_emb_dim, inner), jnp.float32) * sc_in).astype(dtype),
        "bk": (jax.random.normal(ks[3], (1, inner), jnp.float32) * 0.02).astype(dtype),
        "wv": (jax.random.normal(ks[4], (patch_emb_dim, inner), jnp.float32) * sc_in).astype(dtype),
        "bv": (jax.random.normal(ks[5], (1, inner), jnp.float32) * 0.02).astype(dtype),
        "wo": (jax.random.normal(ks[6], (inner, patch_emb_dim), jnp.float32) * sc_inner).astype(dtype),
        "bo": (jax.random.normal(ks[7], (1, patch_emb_dim), jnp.float32) * 0.02).astype(dtype),
    }


if __name__ == "__main__":
    key = jax.random.PRNGKey(0)

    # ---- Case 1: tiny f32 smoke test (single-query-tile path) ----
    B, N, D, H = 2, 8, 32, 8           # head_dim = 4
    k1, k2, key = jax.random.split(key, 3)
    x = jax.random.normal(k1, (B, N, D), jnp.float32)
    raw = init_params(k2, D, H, dtype=jnp.float32)
    fused = fuse_params(raw)           # fused ONCE at init, reused every call

    out = jax.block_until_ready(vit_attention_pallas(x, fused, H))
    ref = vit_attention_ref(x, raw, H)
    assert out.shape == (B, N, D)
    err = float(jnp.max(jnp.abs(out - ref)))
    assert err < 1e-3, f"f32 max abs err {err}"

    # ---- Case 2: bf16 weights/activations + query tiling (scratch path) ----
    B2, N2, D2, H2 = 2, 256, 128, 8    # head_dim = 16, q_tile = 128 -> nq = 2
    k3, k4, key = jax.random.split(key, 3)
    x2 = jax.random.normal(k3, (B2, N2, D2), jnp.float32)
    raw2 = init_params(k4, D2, H2, dtype=jnp.float32)
    fused2 = {k: v.astype(jnp.bfloat16) for k, v in fuse_params(raw2).items()}

    out2 = jax.block_until_ready(
        vit_attention_pallas(x2.astype(jnp.bfloat16), fused2, H2, q_tile=128))
    ref2 = vit_attention_ref(x2, raw2, H2)
    rel = float(jnp.linalg.norm(out2.astype(jnp.float32) - ref2)
                / jnp.linalg.norm(ref2))
    assert out2.shape == (B2, N2, D2)
    assert rel < 0.05, f"bf16 relative L2 err {rel}"

    print("KERNEL_OK")
</pallas_src>

<mosaic_0001>
module attributes {stable_mosaic.version = 11 : i64} {
  func.func @_copy(%arg0: i32, %arg1: memref<8x128xf32, #tpu.memory_space<vmem>>, %arg2: memref<8x128xf32, #tpu.memory_space<vmem>>) attributes {dimension_semantics = [#tpu.dimension_semantics<arbitrary>], iteration_bounds = array<i64: 1>, scalar_prefetch = 0 : i64, scratch_operands = 0 : i64, tpu.core_type = #tpu.core_type<tc>, window_params = [{pipeline_mode = #tpu.pipeline_mode<synchronous>, transform_indices = @transform_0, window_bounds = array<i64: 8, 128>}, {pipeline_mode = #tpu.pipeline_mode<synchronous>, transform_indices = @transform_1, window_bounds = array<i64: 8, 128>}]} {
    %c0 = arith.constant 0 : index
    %c0_0 = arith.constant 0 : index
    %0 = vector.load %arg1[%c0, %c0_0] : memref<8x128xf32, #tpu.memory_space<vmem>>, vector<8x128xf32>
    %c0_1 = arith.constant 0 : index
    %c0_2 = arith.constant 0 : index
    %1 = vector.load %arg2[%c0_1, %c0_2] : memref<8x128xf32, #tpu.memory_space<vmem>>, vector<8x128xf32>
    tpu.vector_store %arg2[%c0_1, %c0_2], %0 {strides = array<i32>} : memref<8x128xf32, #tpu.memory_space<vmem>>, vector<8x128xf32>,
    return
  }
  func.func @transform_0(%arg0: i32) -> (i32, i32) {
    %c0_i32 = arith.constant 0 : i32
    %c0_i32_0 = arith.constant 0 : i32
    %c0_i32_1 = arith.constant 0 : i32
    return %c0_i32, %c0_i32_0 : i32, i32
  }
  func.func @transform_1(%arg0: i32) -> (i32, i32) {
    %c0_i32 = arith.constant 0 : i32
    %c0_i32_0 = arith.constant 0 : i32
    %c0_i32_1 = arith.constant 0 : i32
    return %c0_i32, %c0_i32_0 : i32, i32
  }
}

module attributes {stable_mosaic.version = 11 : i64} {
  func.func @_attn_kernel(%arg0: i32, %arg1: i32, %arg2: memref<1x8x32xf32, #tpu.memory_space<vmem>>, %arg3: memref<32x96xf32, #tpu.memory_space<vmem>>, %arg4: memref<1x96xf32, #tpu.memory_space<vmem>>, %arg5: memref<32x32xf32, #tpu.memory_space<vmem>>, %arg6: memref<1x32xf32, #tpu.memory_space<vmem>>, %arg7: memref<1x8x32xf32, #tpu.memory_space<vmem>>) attributes {dimension_semantics = [#tpu.dimension_semantics<parallel>, #tpu.dimension_semantics<parallel>], iteration_bounds = array<i64: 2, 1>, scalar_prefetch = 0 : i64, scratch_operands = 0 : i64, tpu.core_type = #tpu.core_type<tc>, window_params = [{transform_indices = @transform_0, window_bounds = array<i64: 1, 8, 32>}, {pipeline_mode = #tpu.pipeline_mode<synchronous>, transform_indices = @transform_1, window_bounds = array<i64: 32, 96>}, {pipeline_mode = #tpu.pipeline_mode<synchronous>, transform_indices = @transform_2, window_bounds = array<i64: 1, 96>}, {pipeline_mode = #tpu.pipeline_mode<synchronous>, transform_indices = @transform_3, window_bounds = array<i64: 32, 32>}, {pipeline_mode = #tpu.pipeline_mode<synchronous>, transform_indices = @transform_4, window_bounds = array<i64: 1, 32>}, {transform_indices = @transform_5, window_bounds = array<i64: 1, 8, 32>}]} {
    %c0 = arith.constant 0 : index
    %c0_0 = arith.constant 0 : index
    %c0_1 = arith.constant 0 : index
    %0 = vector.load %arg2[%c0, %c0_0, %c0_1] : memref<1x8x32xf32, #tpu.memory_space<vmem>>, vector<1x8x32xf32>
    %1 = vector.shape_cast %0 : vector<1x8x32xf32> to vector<8x32xf32>
    %c0_2 = arith.constant 0 : index
    %c0_3 = arith.constant 0 : index
    %2 = vector.load %arg3[%c0_2, %c0_3] : memref<32x96xf32, #tpu.memory_space<vmem>>, vector<32x96xf32>
    %cst = arith.constant dense<0.000000e+00> : vector<8x96xf32>
    %3 = tpu.matmul %1, %2, %cst {dimension_numbers = #tpu.dot_dimension_numbers<[1], [0], [0], [1], [0, 0, 1, 1], [], []>} : vector<8x32xf32>, vector<32x96xf32>, vector<8x96xf32> -> vector<8x96xf32>
    %c0_4 = arith.constant 0 : index
    %c0_5 = arith.constant 0 : index
    %4 = vector.load %arg4[%c0_4, %c0_5] : memref<1x96xf32, #tpu.memory_space<vmem>>, vector<1x96xf32>
    %5 = vector.broadcast %4 : vector<1x96xf32> to vector<8x96xf32>
    %6 = arith.addf %3, %5 : vector<8x96xf32>
    %7 = vector.extract_strided_slice %6 {offsets = [0, 0], sizes = [8, 32], strides = [1, 1]} : vector<8x96xf32> to vector<8x32xf32>
    %8 = vector.extract_strided_slice %6 {offsets = [0, 32], sizes = [8, 32], strides = [1, 1]} : vector<8x96xf32> to vector<8x32xf32>
    %9 = vector.extract_strided_slice %6 {offsets = [0, 64], sizes = [8, 32], strides = [1, 1]} : vector<8x96xf32> to vector<8x32xf32>
    %cst_6 = arith.constant 5.000000e-01 : f32
    %10 = vector.broadcast %cst_6 : f32 to vector<8x32xf32>
    %11 = arith.mulf %7, %10 : vector<8x32xf32>
    %12 = vector.shape_cast %11 : vector<8x32xf32> to vector<8x8x4xf32>
    %13 = tpu.transpose %12, [1, 0, 2] : vector<8x8x4xf32> -> vector<8x8x4xf32>
    %14 = vector.shape_cast %8 : vector<8x32xf32> to vector<8x8x4xf32>
    %15 = tpu.transpose %14, [1, 0, 2] : vector<8x8x4xf32> -> vector<8x8x4xf32>
    %16 = vector.shape_cast %9 : vector<8x32xf32> to vector<8x8x4xf32>
    %17 = tpu.transpose %16, [1, 0, 2] : vector<8x8x4xf32> -> vector<8x8x4xf32>
    "tpu.trace_start"() <{level = 10 : i32, message = "hqd,hkd->hqk"}> : () -> ()
    %cst_7 = arith.constant dense<0.000000e+00> : vector<8x8x8xf32>
    %18 = tpu.matmul %13, %15, %cst_7 {dimension_numbers = #tpu.dot_dimension_numbers<[2], [2], [1], [1], [0, 0, 0, 1, 1, 1], [0], [0]>} : vector<8x8x4xf32>, vector<8x8x4xf32>, vector<8x8x8xf32> -> vector<8x8x8xf32>
    "tpu.trace_stop"() : () -> ()
    %cst_8 = arith.constant dense<0xFF800000> : vector<8x8xf32>
    %19 = vector.multi_reduction <maximumf>, %18, %cst_8 [2] : vector<8x8x8xf32> to vector<8x8xf32>
    %20 = vector.shape_cast %19 : vector<8x8xf32> to vector<8x8x1xf32>
    %21 = vector.broadcast %20 : vector<8x8x1xf32> to vector<8x8x8xf32>
    %22 = arith.subf %18, %21 : vector<8x8x8xf32>
    %23 = math.exp %22 : vector<8x8x8xf32>
    %cst_9 = arith.constant dense<0.000000e+00> : vector<8x8xf32>
    %24 = vector.multi_reduction <add>, %23, %cst_9 [2] : vector<8x8x8xf32> to vector<8x8xf32>
    %25 = vector.shape_cast %24 : vector<8x8xf32> to vector<8x8x1xf32>
    %26 = vector.broadcast %25 : vector<8x8x1xf32> to vector<8x8x8xf32>
    %27 = arith.divf %23, %26 : vector<8x8x8xf32>
    "tpu.trace_start"() <{level = 10 : i32, message = "hqk,hkd->hqd"}> : () -> ()
    %cst_10 = arith.constant dense<0.000000e+00> : vector<8x8x4xf32>
    %28 = tpu.matmul %27, %17, %cst_10 {dimension_numbers = #tpu.dot_dimension_numbers<[2], [1], [1], [2], [0, 0, 0, 1, 1, 2], [0], [0]>} : vector<8x8x8xf32>, vector<8x8x4xf32>, vector<8x8x4xf32> -> vector<8x8x4xf32>
    "tpu.trace_stop"() : () -> ()
    %29 = tpu.transpose %28, [1, 0, 2] : vector<8x8x4xf32> -> vector<8x8x4xf32>
    %30 = vector.shape_cast %29 : vector<8x8x4xf32> to vector<8x32xf32>
    %c0_11 = arith.constant 0 : index
    %c0_12 = arith.constant 0 : index
    %31 = vector.load %arg5[%c0_11, %c0_12] : memref<32x32xf32, #tpu.memory_space<vmem>>, vector<32x32xf32>
    %cst_13 = arith.constant dense<0.000000e+00> : vector<8x32xf32>
    %32 = tpu.matmul %30, %31, %cst_13 {dimension_numbers = #tpu.dot_dimension_numbers<[1], [0], [0], [1], [0, 0, 1, 1], [], []>} : vector<8x32xf32>, vector<32x32xf32>, vector<8x32xf32> -> vector<8x32xf32>
    %c0_14 = arith.constant 0 : index
    %c0_15 = arith.constant 0 : index
    %33 = vector.load %arg6[%c0_14, %c0_15] : memref<1x32xf32, #tpu.memory_space<vmem>>, vector<1x32xf32>
    %34 = vector.broadcast %33 : vector<1x32xf32> to vector<8x32xf32>
    %35 = arith.addf %32, %34 : vector<8x32xf32>
    %c0_16 = arith.constant 0 : index
    %c0_17 = arith.constant 0 : index
    %c0_18 = arith.constant 0 : index
    %36 = vector.load %arg7[%c0_16, %c0_17, %c0_18] : memref<1x8x32xf32, #tpu.memory_space<vmem>>, vector<1x8x32xf32>
    %37 = vector.shape_cast %36 : vector<1x8x32xf32> to vector<8x32xf32>
    %38 = vector.shape_cast %35 : vector<8x32xf32> to vector<1x8x32xf32>
    tpu.vector_store %arg7[%c0_16, %c0_17, %c0_18], %38 {strides = array<i32>} : memref<1x8x32xf32, #tpu.memory_space<vmem>>, vector<1x8x32xf32>,
    return
  }
  func.func @transform_0(%arg0: i32, %arg1: i32) -> (i32, i32, i32) {
    %c0_i32 = arith.constant 0 : i32
    %c0_i32_0 = arith.constant 0 : i32
    %c0_i32_1 = arith.constant 0 : i32
    return %arg0, %c0_i32, %c0_i32_0 : i32, i32, i32
  }
  func.func @transform_1(%arg0: i32, %arg1: i32) -> (i32, i32) {
    %c0_i32 = arith.constant 0 : i32
    %c0_i32_0 = arith.constant 0 : i32
    %c0_i32_1 = arith.constant 0 : i32
    return %c0_i32, %c0_i32_0 : i32, i32
  }
  func.func @transform_2(%arg0: i32, %arg1: i32) -> (i32, i32) {
    %c0_i32 = arith.constant 0 : i32
    %c0_i32_0 = arith.constant 0 : i32
    %c0_i32_1 = arith.constant 0 : i32
    return %c0_i32, %c0_i32_0 : i32, i32
  }
  func.func @transform_3(%arg0: i32, %arg1: i32) -> (i32, i32) {
    %c0_i32 = arith.constant 0 : i32
    %c0_i32_0 = arith.constant 0 : i32
    %c0_i32_1 = arith.constant 0 : i32
    return %c0_i32, %c0_i32_0 : i32, i32
  }
  func.func @transform_4(%arg0: i32, %arg1: i32) -> (i32, i32) {
    %c0_i32 = arith.constant 0 : i32
    %c0_i32_0 = arith.constant 0 : i32
    %c0_i32_1 = arith.constant 0 : i32
    return %c0_i32, %c0_i32_0 : i32, i32
  }
  func.func @transform_5(%arg0: i32, %arg1: i32) -> (i32, i32, i32) {
    %c0_i32 = arith.constant 0 : i32
    %c0_i32_0 = arith.constant 0 : i32
    return %arg0, %arg1, %c0_i32 : i32, i32, i32
  }
}

</mosaic_0001>

<bundles_post_ra>
// kernel: tpu_custom_call.1
= control target key start
LH: loop header
LB: loop body
LE: loop exit
PB: predicated region body
PF: predicated region fallthrough
CT: control target
= control target key end

     0   :  { %6 = vsyncpa [#allocation3], 0  ;;  %s102_s0 = inlined_call_operand.hbm [shape: f32[8,128], index: 0, kind: input, shape index: {}]   ;;  %s103_s1 = inlined_call_operand.hbm [shape: f32[8,128], index: 1, kind: output, shape index: {}]  }
   0x1   :  { %7 = vsyncpa [#allocation4], 0  ;;  %s84_s6 = smov [#allocation2]  }
   0x2   :  { %s14_s7 = sshll.u32 %s84_s6, 4  ;;  %s15_s7 = int_to_ptr.vmem [resolvable:$true] %s14_s7 }
   0x3   :  { %s48_s8 = scalar_lea.vmem %s15_s7, 128  ;;  %p53_p1 = scmp.lt.s32.totalorder %s15_s7, %s15_s7 }
   0x4   :  { %p49_p0 = scmp.ne.s32.totalorder %s15_s7, %s48_s8  ;;  %p54_p2 = scmp.lt.s32.totalorder %s48_s8, %s48_s8 }
   0x6   :  { %p55_p3 = por %p54_p2, %p53_p1 }
   0x8   :  { %p56_p4 = pnand %p55_p3, %p49_p0 }
   0xa   :  { %59 = shalt.err (!%p56_p4)
}
   0xb   :  { %17 = dma.hbm_to_vmem [thread:$0]  %s102_s0, 128, %s15_s7, [#allocation3]  }
   0xc   :  { %80 = dma.done.wait [#allocation3], 128  }
   0xd   :  { %81 = vsyncadd [#allocation3], 4294967168  ;;  %s85_s11 = smov [#allocation5]   ;;  %v21_v0 = vld [vmem:[#allocation2] sm:$0xff] }
   0xe   :  { %s29_s12 = sshll.u32 %s85_s11, 4  ;;  %22 = vst [vmem:[#allocation5] sm:$0xff] %v21_v0  ;;  %s30_s12 = int_to_ptr.vmem [resolvable:$true] %s29_s12 }
   0xf   :  { %s60_s13 = scalar_lea.vmem %s30_s12, 128  ;;  %p65_p6 = scmp.lt.s32.totalorder %s30_s12, %s30_s12 }
  0x10   :  { %p61_p5 = scmp.ne.s32.totalorder %s30_s12, %s60_s13  ;;  %p66_p7 = scmp.lt.s32.totalorder %s60_s13, %s60_s13 }
  0x12   :  { %p67_p8 = por %p66_p7, %p65_p6 }
  0x14   :  { %p68_p9 = pnand %p67_p8, %p61_p5 }
  0x16   :  { %71 = shalt.err (!%p68_p9)
}
  0x17   :  { %32 = dma.vmem_to_hbm [thread:$0]  %s30_s12, 128, %s103_s1, [#allocation4]  }
  0x18   :  { %82 = dma.done.wait [#allocation4], 128  }
  0x19   :  { %83 = vsyncadd [#allocation4], 4294967168 }
  0x1a   :  { %36 = vsyncpa [#allocation3], 1 }
  0x1b   :  { %37 = vsyncpa [#allocation4], 1 }

// kernel: tpu_custom_call.1
= control target key start
LH: loop header
LB: loop body
LE: loop exit
PB: predicated region body
PF: predicated region fallthrough
CT: control target
= control target key end

     0   :  { %s4207_s0 = inlined_call_operand.hbm [shape: f32[2,8,32], index: 0, kind: input, shape index: {}]   ;;  %s4208_s1 = inlined_call_operand.hbm [shape: f32[32,96], index: 1, kind: input, shape index: {}]   ;;  %s4209_s2 = inlined_call_operand.vmem [shape: f32[1,96], index: 2, kind: input, shape index: {}]   ;;  %s4210_s3 = inlined_call_operand.hbm [shape: f32[32,32], index: 3, kind: input, shape index: {}]   ;;  %s4211_s4 = inlined_call_operand.vmem [shape: f32[1,32], index: 4, kind: input, shape index: {}]   ;;  %s4212_s5 = inlined_call_operand.hbm [shape: f32[2,8,32], index: 5, kind: output, shape index: {}]  }
   0x1   :  { %4216 = sst [smem:[#allocation12_spill]] %s4208_s1 }
   0x2   :  { %10 = vsyncpa [#allocation3], 0 }
   0x3   :  { %12 = vsyncpa [#allocation3 + $0x1], 0 }
   0x4   :  { %13 = vsyncpa [#allocation6], 0 }
   0x5   :  { %14 = vsyncpa [#allocation4], 0 }
   0x6   :  { %16 = vsyncpa [#allocation4 + $0x1], 0  ;;  %s3643_s18 = smov 0   ;;  %s3645_s19 = smov 0  }
   0x7   :  { %s3647_s20 = smov 0   ;;  %s3649_s21 = smov 0  }
   0x8   :  { %s3651_s22 = smov 0   ;;  %s3653_s23 = smov 0  }
   0x9 LB: > { %s3063_s24 = sadd.s32 4294967295, %s3585_s23   ;;  %s3064_s25 = sadd.s32 4294967294, %s3585_s23   ;;  %s3585_s23 = sphi %s3653_s23, %s22_s23   ;;  %s3581_s22 = sphi %s3651_s22, %s4234_s22   ;;  %s3577_s21 = sphi %s3649_s21, %s4233_s21   ;;  %s3573_s20 = sphi %s3647_s20, %s4232_s20   ;;  %s3569_s19 = sphi %s3645_s19, %s4231_s19   ;;  %s3565_s18 = sphi %s3643_s18, %s4230_s18  }
   0xa   : > { %p54_p0 = scmp.ne.s32.totalorder %s3569_s19, %s3565_s18  ;;  %p3677_p1 = scmp.eq.s32.totalorder %s3063_s24, 0 }
   0xb   : > { %p3681_p2 = scmp.eq.s32.totalorder %s3063_s24, 1  ;;  %p170_p3 = scmp.eq.s32.totalorder %s3064_s25, 1 }
   0xc   : > { %s4217_s26 = scalar_select %p3677_p1, 1, 0 }
   0xd   : > { %p3687_p4 = por %p3677_p1, %p54_p0  ;;  %p3065_p5 = scmp.ge.s32.totalorder %s3585_s23, 1 }
   0xe   : > { %p3692_p6 = por %p170_p3, %p54_p0  ;;  %p177_p7 = scmp.lt.s32.totalorder %s3585_s23, 3 }
   0xf   : > { %s4219_s28 = scalar_select %p3687_p4, 1, 0 }
  0x10   : > { %s4220_s29 = scalar_select %p3692_p6, 1, 0 }
  0x11   : > { %p3697_p8 = pnand %p3065_p5, %p177_p7  ;;  %s3587_s6 = smov [#allocation5]  }
  0x12   : > { %s189_s7 = sshll.u32 %s3587_s6, 4  ;;  %s3588_s9 = smov [#allocation7]   ;;  %s190_s7 = int_to_ptr.vmem [resolvable:$true] %s189_s7 }
  0x13   : > { %p3296_p9 = pneg %p3697_p8  ;;  %s205_s10 = sshll.u32 %s3588_s9, 4  ;;  %s206_s10 = int_to_ptr.vmem [resolvable:$true] %s205_s10 }
  0x14   : > { %s3432_s11 = scalar_lea.vmem %s190_s7, 512  ;;  %p3440_p5 = scmp.lt.s32.totalorder %s190_s7, %s190_s7 }
  0x15   : > { %p3706_p11 = pnand %p3296_p9, %p3677_p1  ;;  %p3433_p13 = scmp.ne.s32.totalorder %s190_s7, %s3432_s11 }
  0x16   : > { %p3441_p7 = scmp.lt.s32.totalorder %s3432_s11, %s3432_s11 }
  0x17   : > { %p3423_p12 = pneg %p3706_p11 }
  0x18   : > { %p3442_p10 = por %p3441_p7, %p3440_p5 }
  0x19   : > { %p3435_p0 = pnand %p3433_p13, %p3423_p12 }
  0x1b   : > { %p3436_p3 = pneg %p3435_p0 }
  0x1d   : > { %p3443_p9 = pnand %p3442_p10, %p3436_p3 }
  0x1f   : > { %3446 = shalt.err (!%p3443_p9)
}
  0x20   : > { %s3589_s12 = smov 128   ;;  %s3590_s13 = smov 8  }
  0x21   : > { %s4223_s1 = sld [smem:[#allocation12_spill]]  ;;  %s3458_s16 = scalar_lea.vmem %s206_s10, 512 }
  0x22   : > { %p3459_p6 = scmp.ne.s32.totalorder %s206_s10, %s3458_s16  ;;  %p3466_p1 = scmp.lt.s32.totalorder %s206_s10, %s206_s10 }
  0x23   : > { %p3467_p4 = scmp.lt.s32.totalorder %s3458_s16, %s3458_s16 }
  0x24   : > { %p3461_p13 = pnand %p3459_p6, %p3423_p12 }
  0x25   : > { %p3468_p5 = por %p3467_p4, %p3466_p1 }
  0x26   : > { %p3462_p0 = pneg %p3461_p13 }
  0x27   : > { %3299 = dma.hbm_to_vmem [thread:$0]  (!%p3706_p11), %s4223_s1, 512, %s190_s7, [#allocation6], %s3589_s12, %s3589_s12, %s3590_s13  }
  0x28   : > { %p3469_p10 = pnand %p3468_p5, %p3462_p0 }
  0x2a   : > { %3472 = shalt.err (!%p3469_p10)
}
  0x2b   : > { %3302 = dma.hbm_to_vmem [thread:$0]  (!%p3706_p11), %s4210_s3, 512, %s206_s10, [#allocation6], %s3589_s12, %s3589_s12, %s3590_s13  }
  0x2c   : > { %s34_s25 = sadd.s32 1, %s3581_s22  ;;  %s41_s6 = sadd.s32 1, %s3573_s20 }
  0x2d   : > { %p36_p1 = scmp.ge.s32.totalorder %s34_s25, 2  ;;  %p48_p4 = scmp.ne.s32.totalorder %s3573_s20, %s3569_s19 }
  0x2e   : > { %p49_p6 = scmp.eq.s32.totalorder %s3585_s23, 0  ;;  %p3313_p12 = scmp.lt.s32.totalorder %s3585_s23, 2 }
  0x2f   : > { %s4236_s25 = smov (%p36_p1, %s34_s25), 0  ;;  %p3738_p7 = por %p3681_p2, %p48_p4 }
  0x30   : > { %p50_p3 = por %p49_p6, %p48_p4  ;;  %s38_s8 = ssub.s32 %s3581_s22, %s4236_s25 }
  0x31   : > { %s222_s9 = sand.u32 1, %s3573_s20   ;;  %p39_p9 = scmp.eq.s32.totalorder %s38_s8, 0 }
  0x32   : > { %s3069_s10 = sshll.u32 %s222_s9, 3  ;;  %s3070_s11 = sshll.u32 %s3581_s22, 7 }
  0x33   : > { %s3747_s12 = scalar_select %p39_p9, %s3573_s20, %s41_s6  }
  0x34   : > { %s231_s15 = scalar_lea.hbm %s4207_s0, %s3070_s11  ;;  %s226_s16 = scalar_lea.vmem [#allocation2], %s3069_s10 }
  0x35   : > { %s233_s17 = sshll.u32 %s226_s16, 4  ;;  %p3754_p11 = pnand %p3313_p12, %p50_p3  ;;  %s234_s17 = int_to_ptr.vmem [resolvable:$true] %s233_s17 }
  0x36   : > { %s223_s24 = scalar_lea.sflag [#allocation3], %s222_s9  ;;  %s3486_s8 = scalar_lea.vmem %s234_s17, 128 }
  0x37   : > { %p3475_p2 = pneg %p3754_p11  ;;  %p3487_p13 = scmp.ne.s32.totalorder %s234_s17, %s3486_s8 }
  0x38   : > { %s3591_s6 = smov [#allocation2]  }
  0x39   : > { %p3489_p0 = pnand %p3487_p13, %p3475_p2  ;;  %s3491_s1 = sshll.u32 %s3591_s6, 4  ;;  %s3492_s1 = int_to_ptr.vmem [resolvable:$false] %s3491_s1 }
  0x3a   : > { %s3493_s11 = scalar_lea.vmem %s3492_s1, 256  ;;  %p3494_p10 = scmp.lt.s32.totalorder %s234_s17, %s3492_s1 }
  0x3b   : > { %p3490_p5 = pneg %p3489_p0  ;;  %p3495_p1 = scmp.lt.s32.totalorder %s3493_s11, %s3486_s8 }
  0x3d   : > { %p3496_p4 = por %p3495_p1, %p3494_p10 }
  0x3f   : > { %p3497_p6 = pnand %p3496_p4, %p3490_p5 }
  0x41   : > { %3500 = shalt.err (!%p3497_p6)
}
  0x42   : > { %3306 = dma.hbm_to_vmem [thread:$0]  (!%p3754_p11), %s231_s15, 128, %s234_s17, %s223_s24  }
  0x43   : > { %242 = sbr.rel (%p3697_p8) target bundleno = 1675 (0x68b), region = 40  ;;  %s3765_s9 = sand.u32 (!%p3697_p8), 1, %s3569_s19  }
  0x44   : > { %s3072_s10 = sshll.u32 (!%p3697_p8), %s3765_s9, 3  ;;  %s245_s13 = scalar_lea.sflag (!%p3697_p8), [#allocation3], %s3765_s9 }
  0x45   : > { %s248_s1 = scalar_lea.vmem (!%p3697_p8), [#allocation2], %s3072_s10  ;;  %p4226_p12 = scmp.ne.s32.totalorder (!%p3697_p8), %s4219_s28, 0 }
  0x48   : > { %3552 = dma.done.wait (%p4226_p12), %s245_s13, 128  }
  0x49   : > { %3554 = vsyncadd (%p4226_p12), %s245_s13, 4294967168  ;;  %p4227_p3 = scmp.ne.s32.totalorder %s4217_s26, 0 }
  0x4b   : > { %3556 = dma.done.wait (%p4227_p3), [#allocation6], 1024  }
  0x4c   : > { %3558 = vsyncadd (%p4227_p3), [#allocation6], 4294966272  ;;  %v3592_v0 = vmov 0.0   ;;  %vm3593_vm0 = vmmov 0   ;;  %v287_v1 = vld [vmem:[#allocation5 + $0x18] sm:$0xff]  ;;  %v286_v2 = vld [vmem:[#allocation5 + $0x10] sm:$0xff]  ;;  %v397_v21 = vlaneseq }
  0x4d   : > { %3182 = vmatprep.subr.mxu0 %v3592_v0  ;;  %3190 = vmatprep.mubr.msk.f32.mxu0 %vm3593_vm0, %v3592_v0  ;;  %v285_v3 = vld [vmem:[#allocation5 + $0x8] sm:$0xff]  ;;  %v284_v4 = vld [vmem:[#allocation5] sm:$0xff]  ;;  %v283_v5 = vld [vmem:[%s248_s1] sm:$0xff]  ;;  %vm295_vm1 = vcmask 261120   ;;  %s3594_s30 = smov 116   ;;  %s3595_s14 = smov 124  }
  0x4e   : > { %3193 = vmatprep.subr.mxu1 %v3592_v0  ;;  %3195 = vmatprep.mubr.msk.f32.mxu1 %vm3593_vm0, %v3592_v0  ;;  %v3076_v6 = vld [vmem:[%s4209_s2] ss:$0 sm:$0xff]  ;;  %s3596_s15 = smov 112   ;;  %s3597_s16 = smov 120   ;;  %v3603_v19 = vmov 1983009808  }
  0x4f   : > { %3183 = vmatpush3.msra.mxu0 %v287_v1  ;;  %s3598_s17 = smov 104   ;;  %s3599_s27 = smov 108   ;;  %v395_v20 = vunpack.c.l.s4 %v3603_v19  ;;  %v3604_v22 = vmov 1934713408   ;;  %v398_v25 = vshrl.u32 %v397_v21, 7  ;;  %vm1271_vm2 = vcmask 31744  }
  0x50   : > { %3184 = vmatprep.subr.mxu0 %v3592_v0  ;;  %s3600_s24 = smov 96   ;;  %s3601_s8 = smov 100   ;;  %v459_v23 = vunpack.c.l.s4 %v3604_v22  ;;  %vm1880_vm3 = vcmask 64512   ;;  %vm2855_vm4 = vcmask 97280   ;;  %vm2857_vm5 = vcmask 130048  }
  0x51   : > { %3185 = vmatpush3.msra.mxu0 %v286_v2  ;;  %s3602_s6 = smov 64   ;;  %v396_v24 = vunpack.c.0.s8 %v395_v20  ;;  %s3605_s11 = smov 8   ;;  %vm2859_vm6 = vcmask 162816   ;;  %vm2861_vm7 = vcmask 195584   ;;  %vm2863_vm8 = vcmask 228352  }
  0x52   : > { %3186 = vmatprep.subr.mxu0 %v3592_v0  ;;  %v460_v28 = vunpack.c.0.s8 %v459_v23  ;;  %s3606_s13 = smov 4   ;;  %s3607_s1 = smov 12  }
  0x53   : > { %3187 = vmatpush3.msra.mxu0 %v285_v3  ;;  %v3822_v29 = vsub.s32 %v396_v24, %v398_v25  ;;  %s3608_s26 = smov 20   ;;  %s3609_s28 = smov 16  }
  0x54   : > { %3188 = vmatprep.subr.mxu0 %v3592_v0  ;;  %v3824_v36 = vsub.s32 %v460_v28, %v398_v25 }
  0x55   : > { %3189 = vmatpush3.msra.mxu0 %v284_v4 }
  0x56   : > { %3191 = vmatmul.mubr.msk.f32.vlgmr.msra.gmra.mxu0 %vm295_vm1, %v283_v5  ;;  %3213 = vmatprep.subr.mxu0 %v3592_v0 }
  0x57   : > { %3215 = vmatprep.mubr.msk.f32.mxu0 %vm3593_vm0, %v3592_v0 }
 0x116   : > { %v365_v7 = vpop.f32.mrf.mxu0 }
 0x117   : > { %v366_v8 = vadd.f32 %v3076_v6, %v365_v7 }
 0x118   : > { %v3192_v9 = vpop.f32.mrf.mxu0 }
 0x119   : > { %669 = vrot.lane.b32.xlu1 %v366_v8, %s3594_s30  ;;  %665 = vrot.lane.b32.xlu0 %v366_v8, %s3595_s14  ;;  %v3795_v10 = vmul.f32 0.5, %v366_v8 }
 0x11d   : > { %671 = vrot.lane.b32.xlu1 %v366_v8, %s3596_s15  ;;  %667 = vrot.lane.b32.xlu0 %v366_v8, %s3597_s16 }
 0x121   : > { %675 = vrot.lane.b32.xlu1 %v366_v8, %s3598_s17  ;;  %673 = vrot.lane.b32.xlu0 %v366_v8, %s3599_s27 }
 0x125   : > { %679 = vrot.lane.b32.xlu1 %v366_v8, %s3600_s24  ;;  %677 = vrot.lane.b32.xlu0 %v366_v8, %s3601_s8 }
 0x129   : > { %371 = vrot.lane.b32.xlu1 %v3795_v10, %s3595_s14  ;;  %s3611_s14 = smov 24  }
 0x18b   : > { %v666_v11 = vpop.permute.xlu0 %665  ;;  %v3798_v12 = vpop.permute.xlu1 %669 }
 0x18c   : > { %681 = vrot.lane.b32.xlu0 %v666_v11, %s3600_s24 }
 0x18f   : > { %v668_v13 = vpop.permute.xlu0 %667  ;;  %v3805_v14 = vpop.permute.xlu1 %671 }
 0x190   : > { %685 = vrot.lane.b32.xlu0 %v3798_v12, %s3600_s24  ;;  %683 = vrot.lane.b32.xlu1 %v668_v13, %s3600_s24 }
 0x193   : > { %v3807_v15 = vpop.permute.xlu0 %673  ;;  %v3811_v16 = vpop.permute.xlu1 %675 }
 0x194   : > { %374 = vrot.lane.b32.xlu0 %v3795_v10, %s3597_s16  ;;  %377 = vrot.lane.b32.xlu1 %v3795_v10, %s3594_s30  ;;  %s3610_s30 = smov 28  }
 0x197   : > { %v3813_v17 = vpop.permute.xlu0 %677  ;;  %v680_v18 = vpop.permute.xlu1 %679 }
 0x198   : > { %380 = vrot.lane.b32.xlu0 %v3795_v10, %s3596_s15  ;;  %383 = vrot.lane.b32.xlu1 %v3795_v10, %s3599_s27  ;;  %s282_s27 = scalar_lea.vmem [#allocation8], %s3072_s10 }
 0x19b   : > { %v372_v26 = vpop.permute.xlu1 %371 }
 0x19c   : > { %687 = vrot.lane.b32.xlu0 %v3805_v14, %s3600_s24  ;;  %689 = vrot.lane.b32.xlu1 %v3807_v15, %s3600_s24 }
 0x1a0   : > { %691 = vrot.lane.b32.xlu0 %v3811_v16, %s3600_s24  ;;  %693 = vrot.lane.b32.xlu1 %v3813_v17, %s3600_s24  ;;  %s2965_s24 = sshll.u32 %s282_s27, 4  ;;  %s2966_s24 = int_to_ptr.vmem [resolvable:$true] %s2965_s24 }
 0x1a4   : > { %386 = vrot.lane.b32.xlu0 %v3795_v10, %s3598_s17  ;;  %389 = vrot.lane.b32.xlu1 %v3795_v10, %s3601_s8  ;;  %s3137_s17 = sshll.u32 %s3577_s21, 7  ;;  %s3612_s21 = smov [#allocation8]  }
 0x1a5   : > { %s3505_s10 = sshll.u32 %s3612_s21, 4  ;;  %s3506_s10 = int_to_ptr.vmem [resolvable:$false] %s3505_s10 }
 0x1a6   : > { %p3508_p2 = scmp.lt.s32.totalorder %s2966_s24, %s3506_s10 }
 0x1a8   : > { %977 = vrot.lane.b32.xlu0 %v666_v11, %s3602_s6  ;;  %975 = vrot.lane.b32.xlu1 %v366_v8, %s3602_s6 }
 0x1ac   : > { %979 = vrot.lane.b32.xlu1 %v668_v13, %s3602_s6 }
 0x1fe   : > { %v682_v27 = vpop.permute.xlu0 %681 }
 0x202   : > { %v686_v30 = vpop.permute.xlu0 %685  ;;  %v684_v31 = vpop.permute.xlu1 %683 }
 0x203   : > { %v719_v32 = vcombine.low %v682_v27, %v686_v30  ;;  %v720_v33 = vcombine.high %v682_v27, %v686_v30  ;;  %v703_v34 = vcombine.low %v680_v18, %v684_v31  ;;  %v704_v35 = vcombine.high %v680_v18, %v684_v31 }
 0x205   : > { %v727_v37 = vrot.slane %v719_v32, %v3822_v29  ;;  %v734_v38 = vrot.slane %v720_v33, %v3822_v29  ;;  %v711_v39 = vrot.slane %v703_v34, %v3822_v29  ;;  %v718_v40 = vrot.slane %v704_v35, %v3822_v29 }
 0x206   : > { %v375_v41 = vpop.permute.xlu0 %374  ;;  %v378_v42 = vpop.permute.xlu1 %377 }
 0x207   : > { %v767_v43 = vcombine.low %v711_v39, %v727_v37  ;;  %v768_v44 = vcombine.high %v711_v39, %v727_v37  ;;  %v783_v45 = vcombine.low %v718_v40, %v734_v38  ;;  %v784_v46 = vcombine.high %v718_v40, %v734_v38 }
 0x208   : > { %v392_v47 = vcombine.low %v3795_v10, %v375_v41  ;;  %v393_v48 = vcombine.high %v3795_v10, %v375_v41  ;;  %v408_v49 = vcombine.low %v372_v26, %v378_v42  ;;  %v409_v50 = vcombine.high %v372_v26, %v378_v42 }
 0x209   : > { %v775_v51 = vrot.slane %v767_v43, %v3824_v36  ;;  %v782_v52 = vrot.slane %v768_v44, %v3824_v36  ;;  %v791_v53 = vrot.slane %v783_v45, %v3824_v36  ;;  %v798_v54 = vrot.slane %v784_v46, %v3824_v36 }
 0x20a   : > { %v400_v55 = vrot.slane %v392_v47, %v3822_v29  ;;  %v407_v56 = vrot.slane %v393_v48, %v3822_v29  ;;  %v416_v57 = vrot.slane %v408_v49, %v3822_v29  ;;  %v423_v58 = vrot.slane %v409_v50, %v3822_v29  ;;  %v3840_v59 = vpop.permute.xlu0 %380  ;;  %v3842_v60 = vpop.permute.xlu1 %383 }
 0x20b   : > { %v3086_v61 = vcombine.low %v775_v51, %v782_v52  ;;  %v3088_v62 = vcombine.high %v775_v51, %v782_v52  ;;  %v3090_v63 = vcombine.low %v791_v53, %v798_v54  ;;  %v3092_v1 = vcombine.high %v791_v53, %v798_v54 }
 0x20c   : > { %v456_v2 = vcombine.low %v400_v55, %v416_v57  ;;  %v457_v3 = vcombine.high %v400_v55, %v416_v57  ;;  %v472_v4 = vcombine.low %v407_v56, %v423_v58  ;;  %v473_v5 = vcombine.high %v407_v56, %v423_v58 }
 0x20d   : > { %v3845_v6 = vrot.slane %v3086_v61, %v3822_v29  ;;  %v3848_v7 = vrot.slane %v3088_v62, %v3822_v29  ;;  %v3851_v8 = vrot.slane %v3090_v63, %v3822_v29  ;;  %v3854_v9 = vrot.slane %v3092_v1, %v3822_v29 }
 0x20e   : > { %v464_v10 = vrot.slane %v456_v2, %v3824_v36  ;;  %v471_v11 = vrot.slane %v457_v3, %v3824_v36  ;;  %v480_v13 = vrot.slane %v472_v4, %v3824_v36  ;;  %v487_v18 = vrot.slane %v473_v5, %v3824_v36  ;;  %v688_v19 = vpop.permute.xlu0 %687  ;;  %v690_v20 = vpop.permute.xlu1 %689 }
 0x20f   : > { %v903_v21 = vcombine.low %v3845_v6, %v3848_v7  ;;  %v935_v22 = vcombine.low %v3851_v8, %v3854_v9  ;;  %v904_v46 = vcombine.high %v3845_v6, %v3848_v7 }
 0x210   : > { %v3078_v23 = vcombine.low %v464_v10, %v471_v11  ;;  %v3080_v24 = vcombine.high %v464_v10, %v471_v11  ;;  %v3082_v25 = vcombine.low %v480_v13, %v487_v18  ;;  %v3084_v26 = vcombine.high %v480_v13, %v487_v18 }
 0x211   : > { %v3865_v27 = vrot.slane %v903_v21, %v3824_v36  ;;  %v3868_v28 = vrot.slane %v935_v22, %v3824_v36 }
 0x212   : > { %v3871_v30 = vrot.slane %v3078_v23, %v3822_v29  ;;  %v3874_v31 = vrot.slane %v3080_v24, %v3822_v29  ;;  %v3877_v32 = vrot.slane %v3082_v25, %v3822_v29  ;;  %v3880_v33 = vrot.slane %v3084_v26, %v3822_v29  ;;  %v692_v34 = vpop.permute.xlu0 %691  ;;  %v694_v35 = vpop.permute.xlu1 %693 }
 0x213   : > { %v735_v37 = vcombine.low %v688_v19, %v692_v34  ;;  %v736_v38 = vcombine.high %v688_v19, %v692_v34  ;;  %v751_v39 = vcombine.low %v690_v20, %v694_v35  ;;  %v752_v40 = vcombine.high %v690_v20, %v694_v35 }
 0x214   : > { %v967_v41 = vcombine.low %v3865_v27, %v3868_v28  ;;  %v592_v49 = vcombine.low %v3871_v30, %v3874_v31  ;;  %v624_v50 = vcombine.low %v3877_v32, %v3880_v33  ;;  %v593_v34 = vcombine.high %v3871_v30, %v3874_v31 }
 0x215   : > { %v743_v42 = vrot.slane %v735_v37, %v3822_v29  ;;  %v750_v43 = vrot.slane %v736_v38, %v3822_v29  ;;  %v759_v44 = vrot.slane %v751_v39, %v3822_v29  ;;  %v766_v45 = vrot.slane %v752_v40, %v3822_v29 }
 0x216   : > { %3194 = vmatpush3.xpose.msk.msra.mxu1 %vm1271_vm2, %v967_v41  ;;  %v387_v47 = vpop.permute.xlu0 %386  ;;  %v390_v48 = vpop.permute.xlu1 %389  ;;  %v936_v35 = vcombine.high %v3851_v8, %v3854_v9  ;;  %v918_v37 = vrot.slane %v904_v46, %v3824_v36  ;;  %v625_v9 = vcombine.high %v3877_v32, %v3880_v33 }
 0x217   : > { %v799_v51 = vcombine.low %v743_v42, %v759_v44  ;;  %v800_v52 = vcombine.high %v743_v42, %v759_v44  ;;  %v815_v53 = vcombine.low %v750_v43, %v766_v45  ;;  %v816_v54 = vcombine.high %v750_v43, %v766_v45  ;;  %3198 = vmatprep.subr.mxu1 %v3592_v0 }
 0x218   : > { %v424_v55 = vcombine.low %v3840_v59, %v387_v47  ;;  %v425_v56 = vcombine.high %v3840_v59, %v387_v47  ;;  %v440_v57 = vcombine.low %v3842_v60, %v390_v48  ;;  %v441_v58 = vcombine.high %v3842_v60, %v390_v48 }
 0x219   : > { %v807_v61 = vrot.slane %v799_v51, %v3824_v36  ;;  %v814_v62 = vrot.slane %v800_v52, %v3824_v36  ;;  %v823_v63 = vrot.slane %v815_v53, %v3824_v36  ;;  %v830_v1 = vrot.slane %v816_v54, %v3824_v36 }
 0x21a   : > { %v432_v2 = vrot.slane %v424_v55, %v3822_v29  ;;  %v439_v3 = vrot.slane %v425_v56, %v3822_v29  ;;  %v448_v4 = vrot.slane %v440_v57, %v3822_v29  ;;  %v455_v59 = vrot.slane %v441_v58, %v3822_v29 }
 0x21b   : > { %v3087_v5 = vcombine.low %v807_v61, %v814_v62  ;;  %v3089_v6 = vcombine.high %v807_v61, %v814_v62  ;;  %v3091_v7 = vcombine.low %v823_v63, %v830_v1  ;;  %v3093_v60 = vcombine.high %v823_v63, %v830_v1 }
 0x21c   : > { %v488_v10 = vcombine.low %v432_v2, %v448_v4  ;;  %v489_v11 = vcombine.high %v432_v2, %v448_v4  ;;  %v504_v13 = vcombine.low %v439_v3, %v455_v59  ;;  %v505_v18 = vcombine.high %v439_v3, %v455_v59 }
 0x21d   : > { %v854_v19 = vrot.slane %v3087_v5, %v3822_v29  ;;  %v870_v20 = vrot.slane %v3089_v6, %v3822_v29  ;;  %v886_v21 = vrot.slane %v3091_v7, %v3822_v29  ;;  %v902_v22 = vrot.slane %v3093_v60, %v3822_v29 }
 0x21e   : > { %v496_v23 = vrot.slane %v488_v10, %v3824_v36  ;;  %v503_v24 = vrot.slane %v489_v11, %v3824_v36  ;;  %v512_v25 = vrot.slane %v504_v13, %v3824_v36  ;;  %v519_v26 = vrot.slane %v505_v18, %v3824_v36 }
 0x21f   : > { %v919_v42 = vcombine.low %v854_v19, %v870_v20  ;;  %v951_v43 = vcombine.low %v886_v21, %v902_v22  ;;  %v600_v44 = vrot.slane %v592_v49, %v3824_v36  ;;  %v632_v45 = vrot.slane %v624_v50, %v3824_v36 }
 0x220   : > { %v3079_v38 = vcombine.low %v496_v23, %v503_v24  ;;  %v3081_v39 = vcombine.high %v496_v23, %v503_v24  ;;  %v3083_v40 = vcombine.low %v512_v25, %v519_v26  ;;  %v3085_v41 = vcombine.high %v512_v25, %v519_v26 }
 0x221   : > { %v920_v31 = vcombine.high %v854_v19, %v870_v20  ;;  %v656_v46 = vcombine.low %v600_v44, %v632_v45  ;;  %v950_v51 = vrot.slane %v936_v35, %v3824_v36  ;;  %v952_v52 = vcombine.high %v886_v21, %v902_v22 }
 0x222   : > { %v543_v47 = vrot.slane %v3079_v38, %v3822_v29  ;;  %v559_v48 = vrot.slane %v3081_v39, %v3822_v29  ;;  %v575_v30 = vrot.slane %v3083_v40, %v3822_v29  ;;  %v591_v8 = vrot.slane %v3085_v41, %v3822_v29 }
 0x223   : > { %v968_v49 = vcombine.high %v3865_v27, %v3868_v28  ;;  %3196 = vmatmul.mubr.msk.f32.vlgmr.msra.gmra.mxu1 %vm1271_vm2, %v656_v46  ;;  %v607_v55 = vrot.slane %v593_v34, %v3824_v36  ;;  %v927_v56 = vrot.slane %v919_v42, %v3824_v36  ;;  %v959_v57 = vrot.slane %v951_v43, %v3824_v36  ;;  %v976_v46 = vpop.permute.xlu1 %975 }
 0x224   : > { %v608_v50 = vcombine.low %v543_v47, %v559_v48  ;;  %v640_v53 = vcombine.low %v575_v30, %v591_v8  ;;  %v609_v54 = vcombine.high %v543_v47, %v559_v48  ;;  %v641_v32 = vcombine.high %v575_v30, %v591_v8  ;;  %3200 = vmatprep.mubr.msk.f32.mxu1 %vm3593_vm0, %v3592_v0 }
 0x225   : > { %3199 = vmatpush3.xpose.msk.msra.mxu1 %vm1271_vm2, %v968_v49  ;;  %v657_v28 = vcombine.high %v600_v44, %v632_v45  ;;  %v639_v58 = vrot.slane %v625_v9, %v3824_v36  ;;  %v971_v61 = vcombine.low %v927_v56, %v959_v57  ;;  %v934_v62 = vrot.slane %v920_v31, %v3824_v36  ;;  %v978_v31 = vpop.permute.xlu0 %977 }
 0x226   : > { %v616_v33 = vrot.slane %v608_v50, %v3824_v36  ;;  %v648_v27 = vrot.slane %v640_v53, %v3824_v36  ;;  %3203 = vmatprep.subr.mxu1 %v3592_v0  ;;  %v969_v63 = vcombine.low %v918_v37, %v950_v51  ;;  %v966_v2 = vrot.slane %v952_v52, %v3824_v36 }
 0x227   : > { %3214 = vmatpush3.xpose.msk.msra.mxu0 %vm1271_vm2, %v971_v61  ;;  %v623_v3 = vrot.slane %v609_v54, %v3824_v36  ;;  %v655_v4 = vrot.slane %v641_v32, %v3824_v36  ;;  %v658_v59 = vcombine.low %v607_v55, %v639_v58  ;;  %v970_v6 = vcombine.high %v918_v37, %v950_v51  ;;  %v980_v49 = vpop.permute.xlu1 %979 }
 0x228   : > { %v660_v1 = vcombine.low %v616_v33, %v648_v27  ;;  %3201 = vmatmul.mubr.msk.f32.vlgmr.msra.gmra.mxu1 %vm1271_vm2, %v657_v28  ;;  %3223 = vmatprep.subr.mxu0 %v3592_v0  ;;  %v973_v5 = vcombine.low %v934_v62, %v966_v2  ;;  %v972_v7 = vcombine.high %v927_v56, %v959_v57 }
 0x229   : > { %3204 = vmatpush3.xpose.msk.msra.mxu1 %vm1271_vm2, %v969_v63  ;;  %3205 = vmatprep.mubr.msk.f32.mxu1 %vm3593_vm0, %v3592_v0  ;;  %v662_v60 = vcombine.low %v623_v3, %v655_v4  ;;  %v659_v10 = vcombine.high %v607_v55, %v639_v58  ;;  %v661_v11 = vcombine.high %v616_v33, %v648_v27 }
 0x22a   : > { %3208 = vmatprep.subr.mxu1 %v3592_v0  ;;  %3216 = vmatmul.mubr.msk.f32.vlgmr.msra.gmra.mxu0 %vm1271_vm2, %v660_v1  ;;  %v974_v13 = vcombine.high %v934_v62, %v966_v2  ;;  %v663_v18 = vcombine.high %v623_v3, %v655_v4  ;;  %v999_v27 = vcombine.low %v976_v46, %v980_v49 }
 0x22b   : > { %3224 = vmatpush3.xpose.msk.msra.mxu0 %vm1271_vm2, %v973_v5  ;;  %3225 = vmatprep.mubr.msk.f32.mxu0 %vm3593_vm0, %v3592_v0 }
 0x22c   : > { %3206 = vmatmul.mubr.msk.f32.vlgmr.msra.gmra.mxu1 %vm1271_vm2, %v658_v59  ;;  %3233 = vmatprep.subr.mxu0 %v3592_v0  ;;  %v1007_v2 = vrot.slane %v999_v27, %v3822_v29 }
 0x22d   : > { %3209 = vmatpush3.xpose.msk.msra.mxu1 %vm1271_vm2, %v970_v6  ;;  %3210 = vmatprep.mubr.msk.f32.mxu1 %vm3593_vm0, %v3592_v0 }
 0x22e   : > { %3218 = vmatprep.subr.mxu1 %v3592_v0  ;;  %3226 = vmatmul.mubr.msk.f32.vlgmr.msra.gmra.mxu0 %vm1271_vm2, %v662_v60 }
 0x22f   : > { %3235 = vmatprep.mubr.msk.f32.mxu0 %vm3593_vm0, %v3592_v0 }
 0x230   : > { %3211 = vmatmul.mubr.msk.f32.vlgmr.msra.gmra.mxu1 %vm1271_vm2, %v659_v10 }
 0x231   : > { %3219 = vmatpush3.xpose.msk.msra.mxu1 %vm1271_vm2, %v972_v7  ;;  %3220 = vmatprep.mubr.msk.f32.mxu1 %vm3593_vm0, %v3592_v0 }
 0x232   : > { %3228 = vmatprep.subr.mxu1 %v3592_v0 }
 0x234   : > { %3221 = vmatmul.mubr.msk.f32.vlgmr.msra.gmra.mxu1 %vm1271_vm2, %v661_v11 }
 0x235   : > { %3229 = vmatpush3.xpose.msk.msra.mxu1 %vm1271_vm2, %v974_v13  ;;  %3230 = vmatprep.mubr.msk.f32.mxu1 %vm3593_vm0, %v3592_v0 }
 0x236   : > { %3238 = vmatprep.subr.mxu1 %v3592_v0 }
 0x238   : > { %3231 = vmatmul.mubr.msk.f32.vlgmr.msra.gmra.mxu1 %vm1271_vm2, %v663_v18 }
 0x239   : > { %3240 = vmatprep.mubr.msk.f32.mxu1 %vm3593_vm0, %v3592_v0 }
 0x2e3   : > { %v1344_v19 = vpop.f32.mrf.mxu1 }
 0x2e4   : > { %v1881_v20 = vsel %vm1880_vm3, %v1344_v19, -inf }
 0x2e5   : > { %1882 = vmax.xlane.f32.xlu0 %v1881_v20  ;;  %v3197_v21 = vpop.f32.mrf.mxu1 }
 0x2e8   : > { %v1420_v22 = vpop.f32.mrf.mxu1 }
 0x2e9   : > { %v1884_v40 = vsel %vm1880_vm3, %v1420_v22, -inf }
 0x2ea   : > { %v3202_v23 = vpop.f32.mrf.mxu1  ;;  %v1648_v24 = vpop.f32.mrf.mxu0 }
 0x2eb   : > { %v1893_v26 = vsel %vm1880_vm3, %v1648_v24, -inf }
 0x2ec   : > { %v1496_v25 = vpop.f32.mrf.mxu1  ;;  %1894 = vmax.xlane.f32.xlu1 %v1893_v26  ;;  %v3217_v35 = vpop.f32.mrf.mxu0 }
 0x2ed   : > { %v1887_v34 = vsel %vm1880_vm3, %v1496_v25, -inf }
 0x2ee   : > { %1888 = vmax.xlane.f32.xlu0 %v1887_v34  ;;  %v3207_v37 = vpop.f32.mrf.mxu1  ;;  %v3983_v38 = vpop.f32.mrf.mxu0 }
 0x2ef   : > { %v1899_v9 = vsel %vm1880_vm3, %v3983_v38, -inf }
 0x2f0   : > { %v3985_v39 = vpop.f32.mrf.mxu1  ;;  %1885 = vmax.xlane.f32.xlu1 %v1884_v40  ;;  %v3227_v42 = vpop.f32.mrf.mxu0 }
 0x2f1   : > { %v1890_v41 = vsel %vm1880_vm3, %v3985_v39, -inf }
 0x2f2   : > { %1891 = vmax.xlane.f32.xlu0 %v1890_v41  ;;  %v3212_v43 = vpop.f32.mrf.mxu1 }
 0x2f4   : > { %v3990_v44 = vpop.f32.mrf.mxu1 }
 0x2f5   : > { %v1896_v45 = vsel %vm1880_vm3, %v3990_v44, -inf }
 0x2f6   : > { %1897 = vmax.xlane.f32.xlu0 %v1896_v45  ;;  %v3222_v47 = vpop.f32.mrf.mxu1 }
 0x2f8   : > { %v1876_v48 = vpop.f32.mrf.mxu1 }
 0x2f9   : > { %v1902_v30 = vsel %vm1880_vm3, %v1876_v48, -inf }
 0x2fa   : > { %1903 = vmax.xlane.f32.xlu0 %v1902_v30  ;;  %v3232_v8 = vpop.f32.mrf.mxu1 }
 0x301   : > { %981 = vrot.lane.b32.xlu1 %v3798_v12, %s3602_s6 }
 0x310   : > { %983 = vrot.lane.b32.xlu0 %v3805_v14, %s3602_s6 }
 0x325   : > { %1900 = vmax.xlane.f32.xlu1 %v1899_v9 }
 0x336   : > { %985 = vrot.lane.b32.xlu1 %v3807_v15, %s3602_s6  ;;  %v1000_v15 = vcombine.high %v976_v46, %v980_v49 }
 0x338   : > { %v1014_v3 = vrot.slane %v1000_v15, %v3822_v29 }
 0x36e   : > { %v1883_v51 = vpop.xlane.xlu0 %1882 }
 0x36f   : > { %v1905_v52 = vsub.f32 %v1344_v19, %v1883_v51 }
 0x371   : > { %v1913_v50 = vmul.f32 1.442695, %v1905_v52 }
 0x373   : > { %3389 = vpow2.f32 %v1913_v50 }
 0x375   : > { %v1895_v53 = vpop.xlane.xlu1 %1894 }
 0x376   : > { %v1909_v12 = vsub.f32 %v1648_v24, %v1895_v53 }
 0x377   : > { %v1889_v54 = vpop.xlane.xlu0 %1888 }
 0x378   : > { %v1907_v55 = vsub.f32 %v1496_v25, %v1889_v54  ;;  %v1921_v56 = vmul.f32 1.442695, %v1909_v12 }
 0x379   : > { %v1886_v57 = vpop.xlane.xlu1 %1885 }
 0x37a   : > { %v1917_v14 = vmul.f32 1.442695, %v1907_v55  ;;  %3391 = vpow2.f32 %v1921_v56  ;;  %v1906_v33 = vsub.f32 %v1420_v22, %v1886_v57 }
 0x37b   : > { %v4003_v32 = vpop.xlane.xlu0 %1891 }
 0x37c   : > { %v1915_v28 = vmul.f32 1.442695, %v1906_v33  ;;  %3393 = vpow2.f32 %v1917_v14  ;;  %v1908_v14 = vsub.f32 %v3985_v39, %v4003_v32 }
 0x37d   : > { %v982_v58 = vpop.permute.xlu1 %981 }
 0x37e   : > { %3395 = vpow2.f32 %v1915_v28  ;;  %v1015_v62 = vcombine.low %v978_v31, %v982_v58  ;;  %v1016_v63 = vcombine.high %v978_v31, %v982_v58  ;;  %v1919_v27 = vmul.f32 1.442695, %v1908_v14 }
 0x37f   : > { %v4005_v61 = vpop.xlane.xlu0 %1897 }
 0x380   : > { %v4007_v1 = vpop.eup %3389  ;;  %v1023_v4 = vrot.slane %v1015_v62, %v3822_v29  ;;  %v1030_v59 = vrot.slane %v1016_v63, %v3822_v29  ;;  %v1910_v15 = vsub.f32 %v3990_v44, %v4005_v61 }
 0x381   : > { %v1929_v5 = vsel %vm1880_vm3, %v4007_v1, 0.0 }
 0x382   : > { %1930 = vadd.xlane.f32.xlu1 %v1929_v5  ;;  %v1063_v7 = vcombine.low %v1007_v2, %v1023_v4  ;;  %v1064_v60 = vcombine.high %v1007_v2, %v1023_v4  ;;  %v1079_v10 = vcombine.low %v1014_v3, %v1030_v59  ;;  %v1080_v11 = vcombine.high %v1014_v3, %v1030_v59 }
 0x383   : > { %v1904_v6 = vpop.xlane.xlu0 %1903  ;;  %v1923_v58 = vmul.f32 1.442695, %v1910_v15 }
 0x384   : > { %v1912_v13 = vsub.f32 %v1876_v48, %v1904_v6  ;;  %v1071_v18 = vrot.slane %v1063_v7, %v3824_v36  ;;  %v1078_v19 = vrot.slane %v1064_v60, %v3824_v36  ;;  %v1087_v20 = vrot.slane %v1079_v10, %v3824_v36 }
 0x385   : > { %v1094_v21 = vrot.slane %v1080_v11, %v3824_v36 }
 0x386   : > { %v1927_v22 = vmul.f32 1.442695, %v1912_v13  ;;  %v3094_v23 = vcombine.low %v1071_v18, %v1078_v19  ;;  %v3096_v24 = vcombine.high %v1071_v18, %v1078_v19 }
 0x387   : > { %v3098_v25 = vcombine.low %v1087_v20, %v1094_v21  ;;  %v3100_v26 = vcombine.high %v1087_v20, %v1094_v21  ;;  %v4019_v34 = vpop.eup %3391  ;;  %v984_v2 = vpop.permute.xlu0 %983 }
 0x388   : > { %3397 = vpow2.f32 %v1927_v22  ;;  %v1143_v35 = vrot.slane %v3094_v23, %v3822_v29  ;;  %v1159_v37 = vrot.slane %v3096_v24, %v3822_v29  ;;  %v1941_v42 = vsel %vm1880_vm3, %v4019_v34, 0.0 }
 0x389   : > { %v1175_v40 = vrot.slane %v3098_v25, %v3822_v29  ;;  %v1191_v41 = vrot.slane %v3100_v26, %v3822_v29  ;;  %v4027_v43 = vpop.eup %3393  ;;  %1942 = vadd.xlane.f32.xlu1 %v1941_v42 }
 0x38a   : > { %v1199_v45 = vcombine.low %v1143_v35, %v1159_v37  ;;  %v1200_v48 = vcombine.high %v1143_v35, %v1159_v37  ;;  %v1935_v52 = vsel %vm1880_vm3, %v4027_v43, 0.0 }
 0x38b   : > { %v1231_v47 = vcombine.low %v1175_v40, %v1191_v41  ;;  %v1232_v30 = vcombine.high %v1175_v40, %v1191_v41  ;;  %v3396_v8 = vpop.eup %3395 }
 0x38c   : > { %v1932_v9 = vsel %vm1880_vm3, %v3396_v8, 0.0  ;;  %v1207_v31 = vrot.slane %v1199_v45, %v3824_v36  ;;  %v1214_v51 = vrot.slane %v1200_v48, %v3824_v36 }
 0x38d   : > { %v1239_v46 = vrot.slane %v1231_v47, %v3824_v36  ;;  %1933 = vadd.xlane.f32.xlu0 %v1932_v9  ;;  %v1246_v49 = vrot.slane %v1232_v30, %v3824_v36  ;;  %1936 = vadd.xlane.f32.xlu1 %v1935_v52 }
 0x38f   : > { %v1263_v50 = vcombine.low %v1207_v31, %v1239_v46  ;;  %v1264_v53 = vcombine.high %v1207_v31, %v1239_v46  ;;  %v1265_v54 = vcombine.low %v1214_v51, %v1246_v49  ;;  %v1266_v12 = vcombine.high %v1214_v51, %v1246_v49 }
 0x391   : > { %3234 = vmatpush3.msra.mxu0 %v1263_v50  ;;  %3239 = vmatpush3.msra.mxu1 %v1264_v53 }
 0x392   : > { %3243 = vmatprep.subr.mxu0 %v3592_v0  ;;  %3248 = vmatprep.subr.mxu1 %v3592_v0 }
 0x395   : > { %v4038_v55 = vpop.eup %3397 }
 0x396   : > { %v1950_v56 = vsel %vm1880_vm3, %v4038_v55, 0.0 }
 0x397   : > { %1951 = vadd.xlane.f32.xlu1 %v1950_v56 }
 0x3a8   : > { %989 = vrot.lane.b32.xlu1 %v3813_v17, %s3602_s6 }
 0x3ae   : > { %v1901_v57 = vpop.xlane.xlu1 %1900 }
 0x3af   : > { %v1911_v33 = vsub.f32 %v3983_v38, %v1901_v57 }
 0x3b1   : > { %v1925_v28 = vmul.f32 1.442695, %v1911_v33 }
 0x3b2   : > { %v986_v44 = vpop.permute.xlu1 %985 }
 0x3b3   : > { %3399 = vpow2.f32 %v1925_v28 }
 0x3b4   : > { %3401 = vpow2.f32 %v1919_v27 }
 0x3b5   : > { %3403 = vpow2.f32 %v1923_v58 }
 0x3c0   : > { %v4049_v62 = vpop.eup %3399 }
 0x3c1   : > { %v1947_v17 = vsel %vm1880_vm3, %v4049_v62, 0.0  ;;  %v3402_v63 = vpop.eup %3401 }
 0x3c2   : > { %1948 = vadd.xlane.f32.xlu0 %v1947_v17  ;;  %v1938_v39 = vsel %vm1880_vm3, %v3402_v63, 0.0  ;;  %v4054_v32 = vpop.eup %3403 }
 0x3c3   : > { %v1944_v38 = vsel %vm1880_vm3, %v4054_v32, 0.0 }
 0x3c6   : > { %1939 = vadd.xlane.f32.xlu0 %v1938_v39 }
 0x3ca   : > { %1945 = vadd.xlane.f32.xlu0 %v1944_v38 }
 0x3e0   : > { %987 = vrot.lane.b32.xlu0 %v3811_v16, %s3602_s6 }
 0x40b   : > { %v1931_v61 = vpop.xlane.xlu1 %1930 }
 0x40c   : > { %3405 = vrcp.f32 %v1931_v61 }
 0x412   : > { %v1943_v3 = vpop.xlane.xlu1 %1942 }
 0x416   : > { %v1934_v4 = vpop.xlane.xlu0 %1933  ;;  %v1937_v59 = vpop.xlane.xlu1 %1936 }
 0x417   : > { %3407 = vrcp.f32 %v1934_v4 }
 0x418   : > { %3409 = vrcp.f32 %v1937_v59 }
 0x419   : > { %v3406_v5 = vpop.eup %3405 }
 0x41a   : > { %v1954_v6 = vmul.f32 %v3406_v5, %v4007_v1 }
 0x41c   : > { %3236 = vmatmul.mubr.msk.f32.vlgmr.msra.gmra.mxu0 %vm1880_vm3, %v1954_v6 }
 0x41d   : > { %3244 = vmatpush3.msra.mxu0 %v1265_v54  ;;  %3245 = vmatprep.mubr.msk.f32.mxu0 %vm3593_vm0, %v3592_v0 }
 0x41e   : > { %3253 = vmatprep.subr.mxu0 %v3592_v0 }
 0x420   : > { %v1952_v11 = vpop.xlane.xlu1 %1951 }
 0x424   : > { %v3408_v16 = vpop.eup %3407  ;;  %v990_v18 = vpop.permute.xlu1 %989 }
 0x425   : > { %v3410_v7 = vpop.eup %3409  ;;  %v1956_v60 = vmul.f32 %v3408_v16, %v3396_v8  ;;  %v1047_v20 = vcombine.low %v986_v44, %v990_v18  ;;  %v1048_v21 = vcombine.high %v986_v44, %v990_v18 }
 0x426   : > { %v1958_v10 = vmul.f32 %v3410_v7, %v4027_v43 }
 0x427   : > { %3241 = vmatmul.mubr.msk.f32.vlgmr.msra.gmra.mxu1 %vm1880_vm3, %v1956_v60  ;;  %v1055_v25 = vrot.slane %v1047_v20, %v3822_v29  ;;  %v1062_v26 = vrot.slane %v1048_v21, %v3822_v29 }
 0x428   : > { %3246 = vmatmul.mubr.msk.f32.vlgmr.msra.gmra.mxu0 %vm1880_vm3, %v1958_v10  ;;  %3249 = vmatpush3.msra.mxu1 %v1266_v12 }
 0x429   : > { %3250 = vmatprep.mubr.msk.f32.mxu1 %vm3593_vm0, %v3592_v0  ;;  %3258 = vmatprep.subr.mxu1 %v3592_v0 }
 0x42a   : > { %3255 = vmatprep.mubr.msk.f32.mxu0 %vm3593_vm0, %v3592_v0 }
 0x44b   : > { %v1949_v1 = vpop.xlane.xlu0 %1948 }
 0x44f   : > { %v1940_v13 = vpop.xlane.xlu0 %1939 }
 0x450   : > { %3411 = vrcp.f32 %v1940_v13 }
 0x451   : > { %3413 = vrcp.f32 %v1943_v3 }
 0x453   : > { %v1946_v19 = vpop.xlane.xlu0 %1945 }
 0x454   : > { %3415 = vrcp.f32 %v1946_v19 }
 0x455   : > { %3417 = vrcp.f32 %v1952_v11 }
 0x456   : > { %3419 = vrcp.f32 %v1949_v1 }
 0x457   : > { %v988_v22 = vpop.permute.xlu0 %987 }
 0x458   : > { %v1031_v23 = vcombine.low %v984_v2, %v988_v22  ;;  %v1032_v24 = vcombine.high %v984_v2, %v988_v22 }
 0x45a   : > { %v1039_v35 = vrot.slane %v1031_v23, %v3822_v29  ;;  %v1046_v37 = vrot.slane %v1032_v24, %v3822_v29 }
 0x45c   : > { %v1095_v40 = vcombine.low %v1039_v35, %v1055_v25  ;;  %v1096_v41 = vcombine.high %v1039_v35, %v1055_v25  ;;  %v1111_v42 = vcombine.low %v1046_v37, %v1062_v26  ;;  %v1112_v43 = vcombine.high %v1046_v37, %v1062_v26 }
 0x45d   : > { %v3412_v45 = vpop.eup %3411 }
 0x45e   : > { %v1103_v47 = vrot.slane %v1095_v40, %v3824_v36  ;;  %v1110_v48 = vrot.slane %v1096_v41, %v3824_v36  ;;  %v1119_v30 = vrot.slane %v1111_v42, %v3824_v36  ;;  %v1126_v8 = vrot.slane %v1112_v43, %v3824_v36  ;;  %v3414_v33 = vpop.eup %3413 }
 0x45f   : > { %v1960_v9 = vmul.f32 %v3412_v45, %v3402_v63  ;;  %v1962_v44 = vmul.f32 %v3414_v33, %v4019_v34 }
 0x460   : > { %v3095_v31 = vcombine.low %v1103_v47, %v1110_v48  ;;  %v3097_v46 = vcombine.high %v1103_v47, %v1110_v48  ;;  %v3099_v51 = vcombine.low %v1119_v30, %v1126_v8  ;;  %v3101_v52 = vcombine.high %v1119_v30, %v1126_v8 }
 0x461   : > { %3251 = vmatmul.mubr.msk.f32.vlgmr.msra.gmra.mxu1 %vm1880_vm3, %v1960_v9  ;;  %v3416_v27 = vpop.eup %3415 }
 0x462   : > { %v1150_v49 = vrot.slane %v3095_v31, %v3822_v29  ;;  %v1166_v50 = vrot.slane %v3097_v46, %v3822_v29  ;;  %v1182_v53 = vrot.slane %v3099_v51, %v3822_v29  ;;  %v1198_v54 = vrot.slane %v3101_v52, %v3822_v29  ;;  %3260 = vmatprep.mubr.msk.f32.mxu1 %vm3593_vm0, %v3592_v0  ;;  %v3418_v63 = vpop.eup %3417  ;;  %v2868_v46 = vld [vmem:[#allocation7 + $0x18] sm:$0xff] }
 0x463   : > { %v1964_v61 = vmul.f32 %v3416_v27, %v4054_v32  ;;  %v3420_v2 = vpop.eup %3419  ;;  %v1968_v34 = vmul.f32 %v3418_v63, %v4038_v55 }
 0x464   : > { %v1215_v12 = vcombine.low %v1150_v49, %v1166_v50  ;;  %v1247_v56 = vcombine.low %v1182_v53, %v1198_v54  ;;  %v1216_v14 = vcombine.high %v1150_v49, %v1166_v50  ;;  %v1248_v57 = vcombine.high %v1182_v53, %v1198_v54 }
 0x465   : > { %v1966_v59 = vmul.f32 %v3420_v2, %v4049_v62 }
 0x466   : > { %v1223_v15 = vrot.slane %v1215_v12, %v3824_v36  ;;  %v1255_v28 = vrot.slane %v1247_v56, %v3824_v36  ;;  %v1230_v58 = vrot.slane %v1216_v14, %v3824_v36  ;;  %v1262_v17 = vrot.slane %v1248_v57, %v3824_v36 }
 0x468   : > { %v1267_v39 = vcombine.low %v1223_v15, %v1255_v28  ;;  %v1268_v38 = vcombine.high %v1223_v15, %v1255_v28  ;;  %v1269_v3 = vcombine.low %v1230_v58, %v1262_v17  ;;  %v1270_v4 = vcombine.high %v1230_v58, %v1262_v17 }
 0x46a   : > { %3254 = vmatpush3.msra.mxu0 %v1267_v39  ;;  %3259 = vmatpush3.msra.mxu1 %v1268_v38 }
 0x46b   : > { %3256 = vmatmul.mubr.msk.f32.vlgmr.msra.gmra.mxu0 %vm1880_vm3, %v1962_v44  ;;  %3261 = vmatmul.mubr.msk.f32.vlgmr.msra.gmra.mxu1 %vm1880_vm3, %v1964_v61 }
 0x46c   : > { %3263 = vmatprep.subr.mxu0 %v3592_v0  ;;  %3268 = vmatprep.subr.mxu1 %v3592_v0 }
 0x46d   : > { %3264 = vmatpush3.msra.mxu0 %v1269_v3  ;;  %3269 = vmatpush3.msra.mxu1 %v1270_v4 }
 0x46e   : > { %3265 = vmatprep.mubr.msk.f32.mxu0 %vm3593_vm0, %v3592_v0  ;;  %3270 = vmatprep.mubr.msk.f32.mxu1 %vm3593_vm0, %v3592_v0 }
 0x46f   : > { %3266 = vmatmul.mubr.msk.f32.vlgmr.msra.gmra.mxu0 %vm1880_vm3, %v1966_v59  ;;  %3271 = vmatmul.mubr.msk.f32.vlgmr.msra.gmra.mxu1 %vm1880_vm3, %v1968_v34 }
 0x470   : > { %3273 = vmatprep.subr.mxu0 %v3592_v0  ;;  %3281 = vmatprep.mubr.msk.f32.mxu0 %vm3593_vm0, %v3592_v0 }
 0x471   : > { %3274 = vmatpush3.msra.mxu0 %v2868_v46 }
 0x472   : > { %3275 = vmatprep.subr.mxu0 %v3592_v0 }
 0x4dc   : > { %v2038_v32 = vpop.f32.mrf.mxu0 }
 0x4de   : > { %v3237_v5 = vpop.f32.mrf.mxu0 }
 0x4e7   : > { %v2111_v62 = vpop.f32.mrf.mxu1 }
 0x4e8   : > { %v2184_v6 = vpop.f32.mrf.mxu0 }
 0x4e9   : > { %v3242_v55 = vpop.f32.mrf.mxu1  ;;  %v2553_v7 = vcombine.low %v2038_v32, %v2184_v6  ;;  %v2554_v60 = vcombine.high %v2038_v32, %v2184_v6  ;;  %v2867_v6 = vld [vmem:[#allocation7 + $0x10] sm:$0xff] }
 0x4ea   : > { %v3247_v16 = vpop.f32.mrf.mxu0  ;;  %v2866_v55 = vld [vmem:[#allocation7 + $0x8] sm:$0xff]  ;;  %3276 = vmatpush3.msra.mxu0 %v2867_v6 }
 0x4eb   : > { %v2561_v18 = vrot.slane %v2553_v7, %v3822_v29  ;;  %v2568_v19 = vrot.slane %v2554_v60, %v3822_v29  ;;  %3277 = vmatprep.subr.mxu0 %v3592_v0 }
 0x4ec   : > { %3278 = vmatpush3.msra.mxu0 %v2866_v55 }
 0x4ed   : > { %3279 = vmatprep.subr.mxu0 %v3592_v0 }
 0x521   : > { %v2257_v10 = vpop.f32.mrf.mxu1 }
 0x522   : > { %v2569_v1 = vcombine.low %v2111_v62, %v2257_v10  ;;  %v2570_v11 = vcombine.high %v2111_v62, %v2257_v10 }
 0x523   : > { %v3252_v13 = vpop.f32.mrf.mxu1 }
 0x524   : > { %v2577_v20 = vrot.slane %v2569_v1, %v3822_v29  ;;  %v2584_v21 = vrot.slane %v2570_v11, %v3822_v29 }
 0x526   : > { %v2617_v22 = vcombine.low %v2561_v18, %v2577_v20  ;;  %v2618_v23 = vcombine.high %v2561_v18, %v2577_v20  ;;  %v2633_v24 = vcombine.low %v2568_v19, %v2584_v21  ;;  %v2634_v25 = vcombine.high %v2568_v19, %v2584_v21 }
 0x528   : > { %v2625_v26 = vrot.slane %v2617_v22, %v3824_v36  ;;  %v2632_v35 = vrot.slane %v2618_v23, %v3824_v36  ;;  %v2641_v37 = vrot.slane %v2633_v24, %v3824_v36  ;;  %v2648_v40 = vrot.slane %v2634_v25, %v3824_v36  ;;  %v2865_v24 = vld [vmem:[#allocation7] sm:$0xff] }
 0x529   : > { %3280 = vmatpush3.msra.mxu0 %v2865_v24 }
 0x52a   : > { %v3126_v41 = vcombine.low %v2625_v26, %v2632_v35  ;;  %v3128_v42 = vcombine.high %v2625_v26, %v2632_v35  ;;  %v3130_v43 = vcombine.low %v2641_v37, %v2648_v40  ;;  %v3132_v45 = vcombine.high %v2641_v37, %v2648_v40 }
 0x52b   : > { %v2330_v47 = vpop.f32.mrf.mxu0  ;;  %v2403_v48 = vpop.f32.mrf.mxu1 }
 0x52c   : > { %v2697_v30 = vrot.slane %v3126_v41, %v3822_v29  ;;  %v2713_v8 = vrot.slane %v3128_v42, %v3822_v29  ;;  %v2729_v9 = vrot.slane %v3130_v43, %v3822_v29  ;;  %v2745_v31 = vrot.slane %v3132_v45, %v3822_v29 }
 0x52d   : > { %v3257_v51 = vpop.f32.mrf.mxu0  ;;  %v3262_v52 = vpop.f32.mrf.mxu1 }
 0x52e   : > { %v2754_v49 = vcombine.high %v2697_v30, %v2713_v8  ;;  %v2786_v50 = vcombine.high %v2729_v9, %v2745_v31  ;;  %v2753_v53 = vcombine.low %v2697_v30, %v2713_v8  ;;  %v2785_v54 = vcombine.low %v2729_v9, %v2745_v31 }
 0x52f   : > { %v2476_v12 = vpop.f32.mrf.mxu0  ;;  %v2549_v56 = vpop.f32.mrf.mxu1 }
 0x530   : > { %v2585_v14 = vcombine.low %v2330_v47, %v2476_v12  ;;  %v2586_v57 = vcombine.high %v2330_v47, %v2476_v12  ;;  %v2601_v33 = vcombine.low %v2403_v48, %v2549_v56  ;;  %v2602_v27 = vcombine.high %v2403_v48, %v2549_v56  ;;  %v3134_v56 = vld [vmem:[%s4211_s4] ss:$0 sm:$0xff] }
 0x531   : > { %v3267_v15 = vpop.f32.mrf.mxu0  ;;  %v3272_v28 = vpop.f32.mrf.mxu1  ;;  %v2768_v58 = vrot.slane %v2754_v49, %v3824_v36  ;;  %v2800_v17 = vrot.slane %v2786_v50, %v3824_v36  ;;  %v4125_v63 = vrot.slane %v2753_v53, %v3824_v36  ;;  %v4128_v39 = vrot.slane %v2785_v54, %v3824_v36 }
 0x532   : > { %v2593_v38 = vrot.slane %v2585_v14, %v3822_v29  ;;  %v2600_v44 = vrot.slane %v2586_v57, %v3822_v29  ;;  %v2609_v61 = vrot.slane %v2601_v33, %v3822_v29  ;;  %v2616_v2 = vrot.slane %v2602_v27, %v3822_v29 }
 0x533   : > { %v2819_v3 = vcombine.low %v2768_v58, %v2800_v17  ;;  %v2818_v4 = vcombine.high %v4125_v63, %v4128_v39  ;;  %v2817_v59 = vcombine.low %v4125_v63, %v4128_v39  ;;  %v2820_v1 = vcombine.high %v2768_v58, %v2800_v17 }
 0x534   : > { %v2649_v34 = vcombine.low %v2593_v38, %v2609_v61  ;;  %v2650_v32 = vcombine.high %v2593_v38, %v2609_v61  ;;  %v2665_v5 = vcombine.low %v2600_v44, %v2616_v2  ;;  %v2666_v62 = vcombine.high %v2600_v44, %v2616_v2 }
 0x535   : > { %2830 = vrot.lane.b32.xlu1 %v2819_v3, %s3605_s11  ;;  %2826 = vrot.lane.b32.xlu0 %v2818_v4, %s3606_s13  ;;  %s4164_s11 = scalar_lea.hbm %s4212_s5, %s3137_s17  ;;  %s2951_s13 = scalar_lea.sflag [#allocation4], %s3765_s9 }
 0x536   : > { %v2657_v16 = vrot.slane %v2649_v34, %v3824_v36  ;;  %v2664_v7 = vrot.slane %v2650_v32, %v3824_v36  ;;  %v2673_v60 = vrot.slane %v2665_v5, %v3824_v36  ;;  %v2680_v10 = vrot.slane %v2666_v62, %v3824_v36 }
 0x538   : > { %v3127_v11 = vcombine.low %v2657_v16, %v2664_v7  ;;  %v3129_v13 = vcombine.high %v2657_v16, %v2664_v7  ;;  %v3131_v18 = vcombine.low %v2673_v60, %v2680_v10  ;;  %v3133_v19 = vcombine.high %v2673_v60, %v2680_v10 }
 0x539   : > { %2834 = vrot.lane.b32.xlu0 %v2820_v1, %s3607_s1  ;;  %s3501_s1 = scalar_lea.vmem %s2966_s24, 128 }
 0x53a   : > { %v2704_v20 = vrot.slane %v3127_v11, %v3822_v29  ;;  %v2720_v21 = vrot.slane %v3129_v13, %v3822_v29  ;;  %v2736_v22 = vrot.slane %v3131_v18, %v3822_v29  ;;  %v2752_v23 = vrot.slane %v3133_v19, %v3822_v29  ;;  %p3502_p8 = scmp.ne.s32.totalorder %s2966_s24, %s3501_s1 }
 0x53c   : > { %v2769_v25 = vcombine.low %v2704_v20, %v2720_v21  ;;  %v2801_v26 = vcombine.low %v2736_v22, %v2752_v23  ;;  %v2770_v35 = vcombine.high %v2704_v20, %v2720_v21  ;;  %v2802_v37 = vcombine.high %v2736_v22, %v2752_v23  ;;  %p3503_p9 = pnand %p3502_p8, %p3738_p7 }
 0x53e   : > { %v2777_v40 = vrot.slane %v2769_v25, %v3824_v36  ;;  %v2809_v41 = vrot.slane %v2801_v26, %v3824_v36  ;;  %v2784_v43 = vrot.slane %v2770_v35, %v3824_v36  ;;  %v2816_v45 = vrot.slane %v2802_v37, %v3824_v36  ;;  %p3504_p11 = pneg %p3503_p9 }
 0x540   : > { %v2822_v42 = vcombine.high %v2777_v40, %v2809_v41  ;;  %v2821_v0 = vcombine.low %v2777_v40, %v2809_v41  ;;  %v2824_v29 = vcombine.high %v2784_v43, %v2816_v45  ;;  %v2823_v47 = vcombine.low %v2784_v43, %v2816_v45 }
 0x542   : > { %2842 = vrot.lane.b32.xlu0 %v2822_v42, %s3608_s26  ;;  %2838 = vrot.lane.b32.xlu1 %v2821_v0, %s3609_s28  ;;  %s3507_s26 = scalar_lea.vmem %s3506_s10, 256 }
 0x543   : > { %p3509_p13 = scmp.lt.s32.totalorder %s3507_s26, %s3501_s1 }
 0x545   : > { %p3510_p0 = por %p3509_p13, %p3508_p2 }
 0x546   : > { %2850 = vrot.lane.b32.xlu0 %v2824_v29, %s3610_s30  ;;  %2846 = vrot.lane.b32.xlu1 %v2823_v47, %s3611_s14 }
 0x547   : > { %p3511_p5 = pnand %p3510_p0, %p3504_p11 }
 0x5a7   : > { %v2827_v48 = vpop.permute.xlu0 %2826  ;;  %v2831_v30 = vpop.permute.xlu1 %2830 }
 0x5a8   : > { %v2853_v8 = vsel %vm1271_vm2, %v2817_v59, %v2827_v48 }
 0x5a9   : > { %v2854_v36 = vsel %vm1880_vm3, %v2853_v8, %v2831_v30 }
 0x5ab   : > { %v2835_v9 = vpop.permute.xlu0 %2834 }
 0x5ac   : > { %v2856_v31 = vsel %vm2855_vm4, %v2854_v36, %v2835_v9 }
 0x5b4   : > { %v2843_v46 = vpop.permute.xlu0 %2842  ;;  %v2839_v51 = vpop.permute.xlu1 %2838 }
 0x5b5   : > { %v2858_v52 = vsel %vm2857_vm5, %v2856_v31, %v2839_v51 }
 0x5b6   : > { %v2860_v50 = vsel %vm2859_vm6, %v2858_v52, %v2843_v46 }
 0x5b8   : > { %v2851_v49 = vpop.permute.xlu0 %2850  ;;  %v2847_v53 = vpop.permute.xlu1 %2846 }
 0x5b9   : > { %v2862_v54 = vsel %vm2861_vm7, %v2860_v50, %v2847_v53 }
 0x5ba   : > { %v2864_v12 = vsel %vm2863_vm8, %v2862_v54, %v2851_v49 }
 0x5bb   : > { %3282 = vmatmul.mubr.msk.f32.vlgmr.msra.gmra.mxu0 %vm295_vm1, %v2864_v12 }
 0x67b   : > { %v2945_v14 = vpop.f32.mrf.mxu0 }
 0x67c   : > { %v2946_v57 = vadd.f32 %v3134_v56, %v2945_v14 }
 0x67d   : > { %v3283_v33 = vpop.f32.mrf.mxu0 }
 0x67e   : > { %2949 = vst.msk [vmem:[%s282_s27] sm:$0xff] %vm295_vm1, %v2946_v57 }
 0x67f   : > { %3514 = shalt.err (!%p3511_p5)
}
 0x680   : > { %s3515_s28 = scalar_lea.hbm %s4164_s11, 128  ;;  %s3519_s14 = scalar_lea.hbm %s4212_s5, 256 }
 0x681   : > { %p3516_p10 = scmp.ne.s32.totalorder %s4164_s11, %s3515_s28  ;;  %p3520_p6 = scmp.lt.s32.totalorder %s4164_s11, %s4212_s5 }
 0x682   : > { %p3521_p12 = scmp.lt.s32.totalorder %s3519_s14, %s3515_s28 }
 0x683   : > { %p3517_p1 = pnand %p3516_p10, %p3738_p7 }
 0x684   : > { %p3522_p3 = por %p3521_p12, %p3520_p6 }
 0x685   : > { %p3518_p4 = pneg %p3517_p1 }
 0x687   : > { %p3523_p8 = pnand %p3522_p3, %p3518_p4 }
 0x689   : > { %3526 = shalt.err (!%p3523_p8)
}
 0x68a   : > { %3294 = dma.vmem_to_hbm [thread:$0]  (%p3738_p7), %s2966_s24, 128, %s4164_s11, %s2951_s13  }
 0x68b PF: > { %s2977_s17 = sand.u32 1, %s3565_s18   ;;  %p4228_p9 = scmp.ne.s32.totalorder %s4220_s29, 0 }
 0x68c   : > { %p4229_p11 = scmp.ge.s32.totalorder %s3585_s23, 2  ;;  %s2978_s27 = scalar_lea.sflag [#allocation4], %s2977_s17 }
 0x68e   : > { %p3308_p2 = pnand %p4229_p11, %p4228_p9 }
 0x690   : > { %p3309_p13 = pneg %p3308_p2 }
 0x692   : > { %3560 = dma.done.wait (%p3309_p13), %s2978_s27, 128  }
 0x693   : > { %3562 = vsyncadd (%p3309_p13), %s2978_s27, 4294967168  ;;  %s22_s23 = sadd.s32 1, %s3585_s23   ;;  %s4230_s18 = smov %s3569_s19 }
 0x694   : > { %p19_p0 = scmp.ge.s32.totalorder %s22_s23, 4   ;;  %s4231_s19 = smov %s3573_s20 }
 0x695   : > { %s4232_s20 = smov %s3747_s12  ;;  %s4233_s21 = smov %s3581_s22 }
 0x696   : > { %s4234_s22 = smov %s4236_s25  ;;  %21 = sbr.rel (!%p19_p0) target bundleno = 9 (0x9), region = 93 }
 0x69b   :  { %2983 = vsyncpa [#allocation3], 1 }
 0x69c   :  { %2985 = vsyncpa [#allocation3 + $0x1], 1 }
 0x69d   :  { %2986 = vsyncpa [#allocation6], 1 }
 0x69e   :  { %2987 = vsyncpa [#allocation4], 1 }
 0x69f   :  { %2989 = vsyncpa [#allocation4 + $0x1], 1 }

</bundles_post_ra>
